<compile_context>
chip_gen: v6e
topology: v6e:2x2x1
jax: 0.10.0
libtpu: 0.0.40
codegen_flags: <defaults>
</compile_context>

<pallas_src>
import math

import jax
import jax.numpy as jnp
from jax import lax
from jax.experimental import pallas as pl
from jax.experimental.pallas import tpu as pltpu

_PI_2 = math.pi / 2.0
_PI_4 = math.pi / 4.0
_TAN_PI_8 = 0.4142135623730951

_LANE = 128
_SUB = 8


def _round_up(x, m):
    return ((x + m - 1) // m) * m


def _cdiv(a, b):
    return -(-a // b)


# --------------------------------------------------------------------------- #
# Shape-agnostic SE3 helpers operating on tuples of component arrays.
# --------------------------------------------------------------------------- #
def _qmul(q1, q2):
    x1, y1, z1, w1 = q1
    x2, y2, z2, w2 = q2
    return (
        w1 * x2 + x1 * w2 + y1 * z2 - z1 * y2,
        w1 * y2 - x1 * z2 + y1 * w2 + z1 * x2,
        w1 * z2 + x1 * y2 - y1 * x2 + z1 * w2,
        w1 * w2 - x1 * x2 - y1 * y2 - z1 * z2,
    )


def _qconj(q):
    x, y, z, w = q
    return (-x, -y, -z, w)


def _cross(a, b):
    ax, ay, az = a
    bx, by, bz = b
    return (ay * bz - az * by, az * bx - ax * bz, ax * by - ay * bx)


def _qrot(q, v):
    # v' = v + 2*w*(qv x v) + 2*qv x (qv x v)   (unit quaternion)
    x, y, z, w = q
    qv = (x, y, z)
    t = _cross(qv, v)
    u = _cross(qv, t)
    return (
        v[0] + 2.0 * (w * t[0] + u[0]),
        v[1] + 2.0 * (w * t[1] + u[1]),
        v[2] + 2.0 * (w * t[2] + u[2]),
    )


def _se3_inv(t, q):
    qi = _qconj(q)
    ti = _qrot(qi, t)
    return (-ti[0], -ti[1], -ti[2]), qi


def _se3_mul(t1, q1, t2, q2):
    rt2 = _qrot(q1, t2)
    return (t1[0] + rt2[0], t1[1] + rt2[1], t1[2] + rt2[2]), _qmul(q1, q2)


# --------------------------------------------------------------------------- #
# First-quadrant atan2 (y >= 0, x >= 0) from +,*,recip,where,compare.
# Single reciprocal; Cephes single-precision atanf polynomial (~2e-6 abs).
# --------------------------------------------------------------------------- #
def _atan_poly(z):
    z2 = z * z
    p = 8.05374449538e-2
    p = p * z2 - 1.38776856032e-1
    p = p * z2 + 1.99777106478e-1
    p = p * z2 - 3.33329491539e-1
    return p * z2 * z + z


def _atan2_first_quadrant(y, x, recip):
    swap = y > x
    num = jnp.where(swap, x, y)
    den = jnp.where(swap, y, x)
    big = num > _TAN_PI_8 * den
    zn = jnp.where(big, num - den, num)
    zd = jnp.where(big, num + den, den)
    z = zn * recip(jnp.maximum(zd, 1e-30))
    a = _atan_poly(z)
    a = jnp.where(big, a + _PI_4, a)
    a = jnp.where(swap, _PI_2 - a, a)
    return a


# --------------------------------------------------------------------------- #
# Shared math: error = poses^-1 * node1^-1 * node2, then SE3 Log.
#   atan2_q1(y, x) : first-quadrant atan2 (y >= 0, x >= 0)
#   recip(v)       : 1/v
#   rsqrt(v)       : 1/sqrt(v)
# --------------------------------------------------------------------------- #
def _error_log(tp, qp, t1, q1, t2, q2, *, atan2_q1, recip, rsqrt):
    tpi, qpi = _se3_inv(tp, qp)
    t1i, q1i = _se3_inv(t1, q1)
    ta, qa = _se3_mul(tpi, qpi, t1i, q1i)
    te, qe = _se3_mul(ta, qa, t2, q2)

    # --- SO3 Log of the error quaternion (principal angle, pypose style) --- #
    x, y, z, w = qe
    n2 = x * x + y * y + z * z
    rn = rsqrt(jnp.maximum(n2, 1e-30))        # ~ 1/||v||
    n = n2 * rn                               # ||v||  (exactly 0 when n2 == 0)
    aw = jnp.abs(w)
    sgn_w = jnp.where(w < 0.0, -1.0, 1.0)
    theta = 2.0 * sgn_w * atan2_q1(n, aw)     # theta in (-pi, pi]

    small = n < 1e-6
    safe_w = jnp.where(small, w, 1.0)
    rw = recip(safe_w)
    scale_small = 2.0 * rw - (2.0 / 3.0) * n2 * rw * rw * rw   # Taylor branch
    scale_big = theta * rn
    scale = jnp.where(small, scale_small, scale_big)
    phi = (scale * x, scale * y, scale * z)

    # --- tau = Jl(phi)^{-1} @ t,  Jl^{-1} = I - 0.5 [phi]x + coef [phi]x^2 --- #
    # Unit-quaternion identities (1+cos = 2 w^2, sin = 2 n w) give
    #   coef = 1/theta^2 - w / (2 theta n)
    # which is regular at theta = pi (w -> 0); theta -> 0 uses the 1/12 Taylor.
    small_t = jnp.abs(theta) < 1e-3
    safe_theta = jnp.where(small_t, 1.0, theta)
    r_theta = recip(safe_theta)
    coef_big = r_theta * r_theta - 0.5 * w * rn * r_theta
    coef = jnp.where(small_t, 1.0 / 12.0, coef_big)

    c1 = _cross(phi, te)
    c2 = _cross(phi, c1)
    tau = (
        te[0] - 0.5 * c1[0] + coef * c2[0],
        te[1] - 0.5 * c1[1] + coef * c2[1],
        te[2] - 0.5 * c1[2] + coef * c2[2],
    )
    return tau, phi


# --------------------------------------------------------------------------- #
# Pallas kernel: refs are component-major slabs (7, r_tile, 128) / (6, r_tile, 128).
# Every per-component value is a dense (r_tile, 128) block -> full vreg use.
# --------------------------------------------------------------------------- #
def _pose_graph_kernel(poses_ref, n1_ref, n2_ref, out_ref):
    # Newton-refined reciprocal / rsqrt: correctness does not depend on the
    # (hardware/emulation dependent) precision of the EUP approximations.
    def recip(v):
        r = pl.reciprocal(v, approx=False)
        return r * (2.0 - v * r)

    def rsqrt(v):
        r = lax.rsqrt(v)
        return r * (1.5 - 0.5 * v * r * r)

    atan2_q1 = lambda yy, xx: _atan2_first_quadrant(yy, xx, recip)

    def unpack(ref):
        # Per-component reads (not one big slab load) to keep vreg pressure low.
        return (ref[0], ref[1], ref[2]), (ref[3], ref[4], ref[5], ref[6])

    tp, qp = unpack(poses_ref)
    t1, q1 = unpack(n1_ref)
    t2, q2 = unpack(n2_ref)

    tau, phi = _error_log(tp, qp, t1, q1, t2, q2,
                          atan2_q1=atan2_q1, recip=recip, rsqrt=rsqrt)

    # Dense (r_tile, 128) slab stores, one per output component.
    out_ref[0] = tau[0]
    out_ref[1] = tau[1]
    out_ref[2] = tau[2]
    out_ref[3] = phi[0]
    out_ref[4] = phi[1]
    out_ref[5] = phi[2]


def _choose_tiling(E, r_tile_req):
    """Rows of 128 lanes; big blocks, but >= 2 blocks when possible (v7x)."""
    R = _cdiv(E, _LANE)
    r_req = max(_SUB, _round_up(min(int(r_tile_req), 512), _SUB))
    num_blocks = max(1, _cdiv(R, r_req))
    if R > _SUB:
        num_blocks = max(num_blocks, 2)       # keep both v7x TensorCores busy
    r_tile = _round_up(_cdiv(R, num_blocks), _SUB)
    R_pad = num_blocks * r_tile
    return r_tile, R_pad, num_blocks


def pose_graph_forward(nodes, edges, poses, *, r_tile=256, component_major_out=False):
    """nodes: (N, 7) SE3; edges: (E, 2) int32; poses: (E, 7) SE3 -> (E, 6) se3."""
    E = edges.shape[0]
    nodes_cm = jnp.asarray(nodes, jnp.float32).T      # (7, N)
    poses_cm = jnp.asarray(poses, jnp.float32).T      # (7, E)

    # Data-dependent gather (index glue) stays in plain JAX, done directly in
    # component-major form so the kernel inputs need no extra transpose pass.
    n1_cm = jnp.take(nodes_cm, edges[:, 0], axis=1)   # (7, E)
    n2_cm = jnp.take(nodes_cm, edges[:, 1], axis=1)   # (7, E)

    r_tile, R_pad, grid = _choose_tiling(E, r_tile)
    E_pad = R_pad * _LANE

    def to_slab(x_cm):
        # Pad with identity SE3 columns (padded lanes stay finite), then view
        # as (7, R_pad, 128): sublane- and lane-dense component-major slabs.
        if E_pad > E:
            pad = jnp.zeros((7, E_pad - E), jnp.float32).at[6, :].set(1.0)
            x_cm = jnp.concatenate([x_cm, pad], axis=1)
        return x_cm.reshape(7, R_pad, _LANE)

    out_cm = pl.pallas_call(
        _pose_graph_kernel,
        out_shape=jax.ShapeDtypeStruct((6, R_pad, _LANE), jnp.float32),
        grid=(grid,),
        in_specs=[
            pl.BlockSpec((7, r_tile, _LANE), lambda i: (0, i, 0)),
            pl.BlockSpec((7, r_tile, _LANE), lambda i: (0, i, 0)),
            pl.BlockSpec((7, r_tile, _LANE), lambda i: (0, i, 0)),
        ],
        out_specs=pl.BlockSpec((6, r_tile, _LANE), lambda i: (0, i, 0)),
        compiler_params=pltpu.CompilerParams(
            dimension_semantics=("parallel",),      # both TCs on v7x
            vmem_limit_bytes=32 * 1024 * 1024,      # explicit headroom (v5e default is 16 MiB)
        ),
    )(to_slab(poses_cm), to_slab(n1_cm), to_slab(n2_cm))

    out = out_cm.reshape(6, E_pad)[:, :E]            # (6, E) component-major
    if component_major_out:
        return out
    # TODO(synk): consumers that accept the (6, E) component-major layout can pass
    # component_major_out=True and skip this narrow-minor-dim transpose pass.
    return out.T


# --------------------------------------------------------------------------- #
# Pure-JAX reference (exact divisions, jnp.arctan2) for the correctness check.
# --------------------------------------------------------------------------- #
def pose_graph_reference(nodes, edges, poses):
    nodes = jnp.asarray(nodes, jnp.float32)
    poses = jnp.asarray(poses, jnp.float32)
    node1 = jnp.take(nodes, edges[:, 0], axis=0)
    node2 = jnp.take(nodes, edges[:, 1], axis=0)

    def unpack(m):
        return (m[:, 0], m[:, 1], m[:, 2]), (m[:, 3], m[:, 4], m[:, 5], m[:, 6])

    tp, qp = unpack(poses)
    t1, q1 = unpack(node1)
    t2, q2 = unpack(node2)
    tau, phi = _error_log(
        tp, qp, t1, q1, t2, q2,
        atan2_q1=jnp.arctan2, recip=lambda v: 1.0 / v, rsqrt=lax.rsqrt,
    )
    return jnp.stack(list(tau) + list(phi), axis=-1)


if __name__ == "__main__":
    N, E = 32, 256
    key = jax.random.PRNGKey(0)
    k1, k2, k3, k4, k5 = jax.random.split(key, 5)

    # The module's pp.Parameter(nodes) -> (N, 7) unit SE3.
    node_t = 0.5 * jax.random.normal(k1, (N, 3), dtype=jnp.float32)
    node_q = jax.random.normal(k2, (N, 4), dtype=jnp.float32)
    node_q = node_q / jnp.linalg.norm(node_q, axis=-1, keepdims=True)
    nodes = jnp.concatenate([node_t, node_q], axis=-1)    # (N, 7)

    # Inputs: edges (E, 2) int32, relative poses (E, 7) unit SE3.
    pose_t = 0.5 * jax.random.normal(k3, (E, 3), dtype=jnp.float32)
    pose_q = jax.random.normal(k4, (E, 4), dtype=jnp.float32)
    pose_q = pose_q / jnp.linalg.norm(pose_q, axis=-1, keepdims=True)
    poses = jnp.concatenate([pose_t, pose_q], axis=-1)    # (E, 7)
    edges = jax.random.randint(k5, (E, 2), 0, N, dtype=jnp.int32)

    fwd = jax.jit(pose_graph_forward)
    out = jax.block_until_ready(fwd(nodes, edges, poses))
    assert out.shape == (E, 6) and out.dtype == jnp.float32

    ref = jax.block_until_ready(pose_graph_reference(nodes, edges, poses))
    if not bool(jnp.allclose(out, ref, atol=3e-3, rtol=3e-3)):
        max_err = float(jnp.max(jnp.abs(out - ref)))
        raise AssertionError(
            f"Pallas PoseGraph kernel mismatch vs reference (max abs err {max_err:.3e})"
        )

    print("KERNEL_OK")
</pallas_src>

<mosaic_0001>
module attributes {stable_mosaic.version = 11 : i64} {
  func.func @_pose_graph_kernel(%arg0: i32, %arg1: memref<7x8x128xf32, #tpu.memory_space<vmem>>, %arg2: memref<7x8x128xf32, #tpu.memory_space<vmem>>, %arg3: memref<7x8x128xf32, #tpu.memory_space<vmem>>, %arg4: memref<6x8x128xf32, #tpu.memory_space<vmem>>) attributes {dimension_semantics = [#tpu.dimension_semantics<parallel>], iteration_bounds = array<i64: 1>, scalar_prefetch = 0 : i64, scratch_operands = 0 : i64, tpu.core_type = #tpu.core_type<tc>, window_params = [{transform_indices = @transform_0, window_bounds = array<i64: 7, 8, 128>}, {transform_indices = @transform_1, window_bounds = array<i64: 7, 8, 128>}, {transform_indices = @transform_2, window_bounds = array<i64: 7, 8, 128>}, {transform_indices = @transform_3, window_bounds = array<i64: 6, 8, 128>}]} {
    %c0 = arith.constant 0 : index
    %c0_0 = arith.constant 0 : index
    %c0_1 = arith.constant 0 : index
    %0 = vector.load %arg1[%c0, %c0_0, %c0_1] : memref<7x8x128xf32, #tpu.memory_space<vmem>>, vector<1x8x128xf32>
    %1 = vector.shape_cast %0 : vector<1x8x128xf32> to vector<8x128xf32>
    %c1 = arith.constant 1 : index
    %c0_2 = arith.constant 0 : index
    %c0_3 = arith.constant 0 : index
    %2 = vector.load %arg1[%c1, %c0_2, %c0_3] : memref<7x8x128xf32, #tpu.memory_space<vmem>>, vector<1x8x128xf32>
    %3 = vector.shape_cast %2 : vector<1x8x128xf32> to vector<8x128xf32>
    %c2 = arith.constant 2 : index
    %c0_4 = arith.constant 0 : index
    %c0_5 = arith.constant 0 : index
    %4 = vector.load %arg1[%c2, %c0_4, %c0_5] : memref<7x8x128xf32, #tpu.memory_space<vmem>>, vector<1x8x128xf32>
    %5 = vector.shape_cast %4 : vector<1x8x128xf32> to vector<8x128xf32>
    %c3 = arith.constant 3 : index
    %c0_6 = arith.constant 0 : index
    %c0_7 = arith.constant 0 : index
    %6 = vector.load %arg1[%c3, %c0_6, %c0_7] : memref<7x8x128xf32, #tpu.memory_space<vmem>>, vector<1x8x128xf32>
    %7 = vector.shape_cast %6 : vector<1x8x128xf32> to vector<8x128xf32>
    %c4 = arith.constant 4 : index
    %c0_8 = arith.constant 0 : index
    %c0_9 = arith.constant 0 : index
    %8 = vector.load %arg1[%c4, %c0_8, %c0_9] : memref<7x8x128xf32, #tpu.memory_space<vmem>>, vector<1x8x128xf32>
    %9 = vector.shape_cast %8 : vector<1x8x128xf32> to vector<8x128xf32>
    %c5 = arith.constant 5 : index
    %c0_10 = arith.constant 0 : index
    %c0_11 = arith.constant 0 : index
    %10 = vector.load %arg1[%c5, %c0_10, %c0_11] : memref<7x8x128xf32, #tpu.memory_space<vmem>>, vector<1x8x128xf32>
    %11 = vector.shape_cast %10 : vector<1x8x128xf32> to vector<8x128xf32>
    %c6 = arith.constant 6 : index
    %c0_12 = arith.constant 0 : index
    %c0_13 = arith.constant 0 : index
    %12 = vector.load %arg1[%c6, %c0_12, %c0_13] : memref<7x8x128xf32, #tpu.memory_space<vmem>>, vector<1x8x128xf32>
    %13 = vector.shape_cast %12 : vector<1x8x128xf32> to vector<8x128xf32>
    %c0_14 = arith.constant 0 : index
    %c0_15 = arith.constant 0 : index
    %c0_16 = arith.constant 0 : index
    %14 = vector.load %arg2[%c0_14, %c0_15, %c0_16] : memref<7x8x128xf32, #tpu.memory_space<vmem>>, vector<1x8x128xf32>
    %15 = vector.shape_cast %14 : vector<1x8x128xf32> to vector<8x128xf32>
    %c1_17 = arith.constant 1 : index
    %c0_18 = arith.constant 0 : index
    %c0_19 = arith.constant 0 : index
    %16 = vector.load %arg2[%c1_17, %c0_18, %c0_19] : memref<7x8x128xf32, #tpu.memory_space<vmem>>, vector<1x8x128xf32>
    %17 = vector.shape_cast %16 : vector<1x8x128xf32> to vector<8x128xf32>
    %c2_20 = arith.constant 2 : index
    %c0_21 = arith.constant 0 : index
    %c0_22 = arith.constant 0 : index
    %18 = vector.load %arg2[%c2_20, %c0_21, %c0_22] : memref<7x8x128xf32, #tpu.memory_space<vmem>>, vector<1x8x128xf32>
    %19 = vector.shape_cast %18 : vector<1x8x128xf32> to vector<8x128xf32>
    %c3_23 = arith.constant 3 : index
    %c0_24 = arith.constant 0 : index
    %c0_25 = arith.constant 0 : index
    %20 = vector.load %arg2[%c3_23, %c0_24, %c0_25] : memref<7x8x128xf32, #tpu.memory_space<vmem>>, vector<1x8x128xf32>
    %21 = vector.shape_cast %20 : vector<1x8x128xf32> to vector<8x128xf32>
    %c4_26 = arith.constant 4 : index
    %c0_27 = arith.constant 0 : index
    %c0_28 = arith.constant 0 : index
    %22 = vector.load %arg2[%c4_26, %c0_27, %c0_28] : memref<7x8x128xf32, #tpu.memory_space<vmem>>, vector<1x8x128xf32>
    %23 = vector.shape_cast %22 : vector<1x8x128xf32> to vector<8x128xf32>
    %c5_29 = arith.constant 5 : index
    %c0_30 = arith.constant 0 : index
    %c0_31 = arith.constant 0 : index
    %24 = vector.load %arg2[%c5_29, %c0_30, %c0_31] : memref<7x8x128xf32, #tpu.memory_space<vmem>>, vector<1x8x128xf32>
    %25 = vector.shape_cast %24 : vector<1x8x128xf32> to vector<8x128xf32>
    %c6_32 = arith.constant 6 : index
    %c0_33 = arith.constant 0 : index
    %c0_34 = arith.constant 0 : index
    %26 = vector.load %arg2[%c6_32, %c0_33, %c0_34] : memref<7x8x128xf32, #tpu.memory_space<vmem>>, vector<1x8x128xf32>
    %27 = vector.shape_cast %26 : vector<1x8x128xf32> to vector<8x128xf32>
    %c0_35 = arith.constant 0 : index
    %c0_36 = arith.constant 0 : index
    %c0_37 = arith.constant 0 : index
    %28 = vector.load %arg3[%c0_35, %c0_36, %c0_37] : memref<7x8x128xf32, #tpu.memory_space<vmem>>, vector<1x8x128xf32>
    %29 = vector.shape_cast %28 : vector<1x8x128xf32> to vector<8x128xf32>
    %c1_38 = arith.constant 1 : index
    %c0_39 = arith.constant 0 : index
    %c0_40 = arith.constant 0 : index
    %30 = vector.load %arg3[%c1_38, %c0_39, %c0_40] : memref<7x8x128xf32, #tpu.memory_space<vmem>>, vector<1x8x128xf32>
    %31 = vector.shape_cast %30 : vector<1x8x128xf32> to vector<8x128xf32>
    %c2_41 = arith.constant 2 : index
    %c0_42 = arith.constant 0 : index
    %c0_43 = arith.constant 0 : index
    %32 = vector.load %arg3[%c2_41, %c0_42, %c0_43] : memref<7x8x128xf32, #tpu.memory_space<vmem>>, vector<1x8x128xf32>
    %33 = vector.shape_cast %32 : vector<1x8x128xf32> to vector<8x128xf32>
    %c3_44 = arith.constant 3 : index
    %c0_45 = arith.constant 0 : index
    %c0_46 = arith.constant 0 : index
    %34 = vector.load %arg3[%c3_44, %c0_45, %c0_46] : memref<7x8x128xf32, #tpu.memory_space<vmem>>, vector<1x8x128xf32>
    %35 = vector.shape_cast %34 : vector<1x8x128xf32> to vector<8x128xf32>
    %c4_47 = arith.constant 4 : index
    %c0_48 = arith.constant 0 : index
    %c0_49 = arith.constant 0 : index
    %36 = vector.load %arg3[%c4_47, %c0_48, %c0_49] : memref<7x8x128xf32, #tpu.memory_space<vmem>>, vector<1x8x128xf32>
    %37 = vector.shape_cast %36 : vector<1x8x128xf32> to vector<8x128xf32>
    %c5_50 = arith.constant 5 : index
    %c0_51 = arith.constant 0 : index
    %c0_52 = arith.constant 0 : index
    %38 = vector.load %arg3[%c5_50, %c0_51, %c0_52] : memref<7x8x128xf32, #tpu.memory_space<vmem>>, vector<1x8x128xf32>
    %39 = vector.shape_cast %38 : vector<1x8x128xf32> to vector<8x128xf32>
    %c6_53 = arith.constant 6 : index
    %c0_54 = arith.constant 0 : index
    %c0_55 = arith.constant 0 : index
    %40 = vector.load %arg3[%c6_53, %c0_54, %c0_55] : memref<7x8x128xf32, #tpu.memory_space<vmem>>, vector<1x8x128xf32>
    %41 = vector.shape_cast %40 : vector<1x8x128xf32> to vector<8x128xf32>
    %cst = arith.constant 0.000000e+00 : f32
    %42 = vector.broadcast %cst : f32 to vector<8x128xf32>
    %43 = arith.subf %42, %7 : vector<8x128xf32>
    %cst_56 = arith.constant 0.000000e+00 : f32
    %44 = vector.broadcast %cst_56 : f32 to vector<8x128xf32>
    %45 = arith.subf %44, %9 : vector<8x128xf32>
    %cst_57 = arith.constant 0.000000e+00 : f32
    %46 = vector.broadcast %cst_57 : f32 to vector<8x128xf32>
    %47 = arith.subf %46, %11 : vector<8x128xf32>
    %48 = arith.mulf %45, %5 : vector<8x128xf32>
    %49 = arith.mulf %47, %3 : vector<8x128xf32>
    %50 = arith.subf %48, %49 : vector<8x128xf32>
    %51 = arith.mulf %47, %1 : vector<8x128xf32>
    %52 = arith.mulf %43, %5 : vector<8x128xf32>
    %53 = arith.subf %51, %52 : vector<8x128xf32>
    %54 = arith.mulf %43, %3 : vector<8x128xf32>
    %55 = arith.mulf %45, %1 : vector<8x128xf32>
    %56 = arith.subf %54, %55 : vector<8x128xf32>
    %57 = arith.mulf %45, %56 : vector<8x128xf32>
    %58 = arith.mulf %47, %53 : vector<8x128xf32>
    %59 = arith.subf %57, %58 : vector<8x128xf32>
    %60 = arith.mulf %47, %50 : vector<8x128xf32>
    %61 = arith.mulf %43, %56 : vector<8x128xf32>
    %62 = arith.subf %60, %61 : vector<8x128xf32>
    %63 = arith.mulf %43, %53 : vector<8x128xf32>
    %64 = arith.mulf %45, %50 : vector<8x128xf32>
    %65 = arith.subf %63, %64 : vector<8x128xf32>
    %66 = arith.mulf %13, %50 : vector<8x128xf32>
    %67 = arith.addf %66, %59 : vector<8x128xf32>
    %cst_58 = arith.constant 2.000000e+00 : f32
    %68 = vector.broadcast %cst_58 : f32 to vector<8x128xf32>
    %69 = arith.mulf %68, %67 : vector<8x128xf32>
    %70 = arith.addf %1, %69 : vector<8x128xf32>
    %71 = arith.mulf %13, %53 : vector<8x128xf32>
    %72 = arith.addf %71, %62 : vector<8x128xf32>
    %cst_59 = arith.constant 2.000000e+00 : f32
    %73 = vector.broadcast %cst_59 : f32 to vector<8x128xf32>
    %74 = arith.mulf %73, %72 : vector<8x128xf32>
    %75 = arith.addf %3, %74 : vector<8x128xf32>
    %76 = arith.mulf %13, %56 : vector<8x128xf32>
    %77 = arith.addf %76, %65 : vector<8x128xf32>
    %cst_60 = arith.constant 2.000000e+00 : f32
    %78 = vector.broadcast %cst_60 : f32 to vector<8x128xf32>
    %79 = arith.mulf %78, %77 : vector<8x128xf32>
    %80 = arith.addf %5, %79 : vector<8x128xf32>
    %cst_61 = arith.constant 0.000000e+00 : f32
    %81 = vector.broadcast %cst_61 : f32 to vector<8x128xf32>
    %82 = arith.subf %81, %70 : vector<8x128xf32>
    %cst_62 = arith.constant 0.000000e+00 : f32
    %83 = vector.broadcast %cst_62 : f32 to vector<8x128xf32>
    %84 = arith.subf %83, %75 : vector<8x128xf32>
    %cst_63 = arith.constant 0.000000e+00 : f32
    %85 = vector.broadcast %cst_63 : f32 to vector<8x128xf32>
    %86 = arith.subf %85, %80 : vector<8x128xf32>
    %cst_64 = arith.constant 0.000000e+00 : f32
    %87 = vector.broadcast %cst_64 : f32 to vector<8x128xf32>
    %88 = arith.subf %87, %21 : vector<8x128xf32>
    %cst_65 = arith.constant 0.000000e+00 : f32
    %89 = vector.broadcast %cst_65 : f32 to vector<8x128xf32>
    %90 = arith.subf %89, %23 : vector<8x128xf32>
    %cst_66 = arith.constant 0.000000e+00 : f32
    %91 = vector.broadcast %cst_66 : f32 to vector<8x128xf32>
    %92 = arith.subf %91, %25 : vector<8x128xf32>
    %93 = arith.mulf %90, %19 : vector<8x128xf32>
    %94 = arith.mulf %92, %17 : vector<8x128xf32>
    %95 = arith.subf %93, %94 : vector<8x128xf32>
    %96 = arith.mulf %92, %15 : vector<8x128xf32>
    %97 = arith.mulf %88, %19 : vector<8x128xf32>
    %98 = arith.subf %96, %97 : vector<8x128xf32>
    %99 = arith.mulf %88, %17 : vector<8x128xf32>
    %100 = arith.mulf %90, %15 : vector<8x128xf32>
    %101 = arith.subf %99, %100 : vector<8x128xf32>
    %102 = arith.mulf %90, %101 : vector<8x128xf32>
    %103 = arith.mulf %92, %98 : vector<8x128xf32>
    %104 = arith.subf %102, %103 : vector<8x128xf32>
    %105 = arith.mulf %92, %95 : vector<8x128xf32>
    %106 = arith.mulf %88, %101 : vector<8x128xf32>
    %107 = arith.subf %105, %106 : vector<8x128xf32>
    %108 = arith.mulf %88, %98 : vector<8x128xf32>
    %109 = arith.mulf %90, %95 : vector<8x128xf32>
    %110 = arith.subf %108, %109 : vector<8x128xf32>
    %111 = arith.mulf %27, %95 : vector<8x128xf32>
    %112 = arith.addf %111, %104 : vector<8x128xf32>
    %cst_67 = arith.constant 2.000000e+00 : f32
    %113 = vector.broadcast %cst_67 : f32 to vector<8x128xf32>
    %114 = arith.mulf %113, %112 : vector<8x128xf32>
    %115 = arith.addf %15, %114 : vector<8x128xf32>
    %116 = arith.mulf %27, %98 : vector<8x128xf32>
    %117 = arith.addf %116, %107 : vector<8x128xf32>
    %cst_68 = arith.constant 2.000000e+00 : f32
    %118 = vector.broadcast %cst_68 : f32 to vector<8x128xf32>
    %119 = arith.mulf %118, %117 : vector<8x128xf32>
    %120 = arith.addf %17, %119 : vector<8x128xf32>
    %121 = arith.mulf %27, %101 : vector<8x128xf32>
    %122 = arith.addf %121, %110 : vector<8x128xf32>
    %cst_69 = arith.constant 2.000000e+00 : f32
    %123 = vector.broadcast %cst_69 : f32 to vector<8x128xf32>
    %124 = arith.mulf %123, %122 : vector<8x128xf32>
    %125 = arith.addf %19, %124 : vector<8x128xf32>
    %cst_70 = arith.constant 0.000000e+00 : f32
    %126 = vector.broadcast %cst_70 : f32 to vector<8x128xf32>
    %127 = arith.subf %126, %115 : vector<8x128xf32>
    %cst_71 = arith.constant 0.000000e+00 : f32
    %128 = vector.broadcast %cst_71 : f32 to vector<8x128xf32>
    %129 = arith.subf %128, %120 : vector<8x128xf32>
    %cst_72 = arith.constant 0.000000e+00 : f32
    %130 = vector.broadcast %cst_72 : f32 to vector<8x128xf32>
    %131 = arith.subf %130, %125 : vector<8x128xf32>
    %132 = arith.mulf %45, %131 : vector<8x128xf32>
    %133 = arith.mulf %47, %129 : vector<8x128xf32>
    %134 = arith.subf %132, %133 : vector<8x128xf32>
    %135 = arith.mulf %47, %127 : vector<8x128xf32>
    %136 = arith.mulf %43, %131 : vector<8x128xf32>
    %137 = arith.subf %135, %136 : vector<8x128xf32>
    %138 = arith.mulf %43, %129 : vector<8x128xf32>
    %139 = arith.mulf %45, %127 : vector<8x128xf32>
    %140 = arith.subf %138, %139 : vector<8x128xf32>
    %141 = arith.mulf %45, %140 : vector<8x128xf32>
    %142 = arith.mulf %47, %137 : vector<8x128xf32>
    %143 = arith.subf %141, %142 : vector<8x128xf32>
    %144 = arith.mulf %47, %134 : vector<8x128xf32>
    %145 = arith.mulf %43, %140 : vector<8x128xf32>
    %146 = arith.subf %144, %145 : vector<8x128xf32>
    %147 = arith.mulf %43, %137 : vector<8x128xf32>
    %148 = arith.mulf %45, %134 : vector<8x128xf32>
    %149 = arith.subf %147, %148 : vector<8x128xf32>
    %150 = arith.mulf %13, %134 : vector<8x128xf32>
    %151 = arith.addf %150, %143 : vector<8x128xf32>
    %cst_73 = arith.constant 2.000000e+00 : f32
    %152 = vector.broadcast %cst_73 : f32 to vector<8x128xf32>
    %153 = arith.mulf %152, %151 : vector<8x128xf32>
    %154 = arith.addf %127, %153 : vector<8x128xf32>
    %155 = arith.mulf %13, %137 : vector<8x128xf32>
    %156 = arith.addf %155, %146 : vector<8x128xf32>
    %cst_74 = arith.constant 2.000000e+00 : f32
    %157 = vector.broadcast %cst_74 : f32 to vector<8x128xf32>
    %158 = arith.mulf %157, %156 : vector<8x128xf32>
    %159 = arith.addf %129, %158 : vector<8x128xf32>
    %160 = arith.mulf %13, %140 : vector<8x128xf32>
    %161 = arith.addf %160, %149 : vector<8x128xf32>
    %cst_75 = arith.constant 2.000000e+00 : f32
    %162 = vector.broadcast %cst_75 : f32 to vector<8x128xf32>
    %163 = arith.mulf %162, %161 : vector<8x128xf32>
    %164 = arith.addf %131, %163 : vector<8x128xf32>
    %165 = arith.addf %82, %154 : vector<8x128xf32>
    %166 = arith.addf %84, %159 : vector<8x128xf32>
    %167 = arith.addf %86, %164 : vector<8x128xf32>
    %168 = arith.mulf %13, %88 : vector<8x128xf32>
    %169 = arith.mulf %43, %27 : vector<8x128xf32>
    %170 = arith.addf %168, %169 : vector<8x128xf32>
    %171 = arith.mulf %45, %92 : vector<8x128xf32>
    %172 = arith.addf %170, %171 : vector<8x128xf32>
    %173 = arith.mulf %47, %90 : vector<8x128xf32>
    %174 = arith.subf %172, %173 : vector<8x128xf32>
    %175 = arith.mulf %13, %90 : vector<8x128xf32>
    %176 = arith.mulf %43, %92 : vector<8x128xf32>
    %177 = arith.subf %175, %176 : vector<8x128xf32>
    %178 = arith.mulf %45, %27 : vector<8x128xf32>
    %179 = arith.addf %177, %178 : vector<8x128xf32>
    %180 = arith.mulf %47, %88 : vector<8x128xf32>
    %181 = arith.addf %179, %180 : vector<8x128xf32>
    %182 = arith.mulf %13, %92 : vector<8x128xf32>
    %183 = arith.mulf %43, %90 : vector<8x128xf32>
    %184 = arith.addf %182, %183 : vector<8x128xf32>
    %185 = arith.mulf %45, %88 : vector<8x128xf32>
    %186 = arith.subf %184, %185 : vector<8x128xf32>
    %187 = arith.mulf %47, %27 : vector<8x128xf32>
    %188 = arith.addf %186, %187 : vector<8x128xf32>
    %189 = arith.mulf %13, %27 : vector<8x128xf32>
    %190 = arith.mulf %43, %88 : vector<8x128xf32>
    %191 = arith.subf %189, %190 : vector<8x128xf32>
    %192 = arith.mulf %45, %90 : vector<8x128xf32>
    %193 = arith.subf %191, %192 : vector<8x128xf32>
    %194 = arith.mulf %47, %92 : vector<8x128xf32>
    %195 = arith.subf %193, %194 : vector<8x128xf32>
    %196 = arith.mulf %181, %33 : vector<8x128xf32>
    %197 = arith.mulf %188, %31 : vector<8x128xf32>
    %198 = arith.subf %196, %197 : vector<8x128xf32>
    %199 = arith.mulf %188, %29 : vector<8x128xf32>
    %200 = arith.mulf %174, %33 : vector<8x128xf32>
    %201 = arith.subf %199, %200 : vector<8x128xf32>
    %202 = arith.mulf %174, %31 : vector<8x128xf32>
    %203 = arith.mulf %181, %29 : vector<8x128xf32>
    %204 = arith.subf %202, %203 : vector<8x128xf32>
    %205 = arith.mulf %181, %204 : vector<8x128xf32>
    %206 = arith.mulf %188, %201 : vector<8x128xf32>
    %207 = arith.subf %205, %206 : vector<8x128xf32>
    %208 = arith.mulf %188, %198 : vector<8x128xf32>
    %209 = arith.mulf %174, %204 : vector<8x128xf32>
    %210 = arith.subf %208, %209 : vector<8x128xf32>
    %211 = arith.mulf %174, %201 : vector<8x128xf32>
    %212 = arith.mulf %181, %198 : vector<8x128xf32>
    %213 = arith.subf %211, %212 : vector<8x128xf32>
    %214 = arith.mulf %195, %198 : vector<8x128xf32>
    %215 = arith.addf %214, %207 : vector<8x128xf32>
    %cst_76 = arith.constant 2.000000e+00 : f32
    %216 = vector.broadcast %cst_76 : f32 to vector<8x128xf32>
    %217 = arith.mulf %216, %215 : vector<8x128xf32>
    %218 = arith.addf %29, %217 : vector<8x128xf32>
    %219 = arith.mulf %195, %201 : vector<8x128xf32>
    %220 = arith.addf %219, %210 : vector<8x128xf32>
    %cst_77 = arith.constant 2.000000e+00 : f32
    %221 = vector.broadcast %cst_77 : f32 to vector<8x128xf32>
    %222 = arith.mulf %221, %220 : vector<8x128xf32>
    %223 = arith.addf %31, %222 : vector<8x128xf32>
    %224 = arith.mulf %195, %204 : vector<8x128xf32>
    %225 = arith.addf %224, %213 : vector<8x128xf32>
    %cst_78 = arith.constant 2.000000e+00 : f32
    %226 = vector.broadcast %cst_78 : f32 to vector<8x128xf32>
    %227 = arith.mulf %226, %225 : vector<8x128xf32>
    %228 = arith.addf %33, %227 : vector<8x128xf32>
    %229 = arith.addf %165, %218 : vector<8x128xf32>
    %230 = arith.addf %166, %223 : vector<8x128xf32>
    %231 = arith.addf %167, %228 : vector<8x128xf32>
    %232 = arith.mulf %195, %35 : vector<8x128xf32>
    %233 = arith.mulf %174, %41 : vector<8x128xf32>
    %234 = arith.addf %232, %233 : vector<8x128xf32>
    %235 = arith.mulf %181, %39 : vector<8x128xf32>
    %236 = arith.addf %234, %235 : vector<8x128xf32>
    %237 = arith.mulf %188, %37 : vector<8x128xf32>
    %238 = arith.subf %236, %237 : vector<8x128xf32>
    %239 = arith.mulf %195, %37 : vector<8x128xf32>
    %240 = arith.mulf %174, %39 : vector<8x128xf32>
    %241 = arith.subf %239, %240 : vector<8x128xf32>
    %242 = arith.mulf %181, %41 : vector<8x128xf32>
    %243 = arith.addf %241, %242 : vector<8x128xf32>
    %244 = arith.mulf %188, %35 : vector<8x128xf32>
    %245 = arith.addf %243, %244 : vector<8x128xf32>
    %246 = arith.mulf %195, %39 : vector<8x128xf32>
    %247 = arith.mulf %174, %37 : vector<8x128xf32>
    %248 = arith.addf %246, %247 : vector<8x128xf32>
    %249 = arith.mulf %181, %35 : vector<8x128xf32>
    %250 = arith.subf %248, %249 : vector<8x128xf32>
    %251 = arith.mulf %188, %41 : vector<8x128xf32>
    %252 = arith.addf %250, %251 : vector<8x128xf32>
    %253 = arith.mulf %195, %41 : vector<8x128xf32>
    %254 = arith.mulf %174, %35 : vector<8x128xf32>
    %255 = arith.subf %253, %254 : vector<8x128xf32>
    %256 = arith.mulf %181, %37 : vector<8x128xf32>
    %257 = arith.subf %255, %256 : vector<8x128xf32>
    %258 = arith.mulf %188, %39 : vector<8x128xf32>
    %259 = arith.subf %257, %258 : vector<8x128xf32>
    %260 = arith.mulf %238, %238 : vector<8x128xf32>
    %261 = arith.mulf %245, %245 : vector<8x128xf32>
    %262 = arith.addf %260, %261 : vector<8x128xf32>
    %263 = arith.mulf %252, %252 : vector<8x128xf32>
    %264 = arith.addf %262, %263 : vector<8x128xf32>
    %cst_79 = arith.constant 1.000000e-30 : f32
    %265 = vector.broadcast %cst_79 : f32 to vector<8x128xf32>
    %266 = arith.maximumf %264, %265 : vector<8x128xf32>
    %267 = math.rsqrt %266 : vector<8x128xf32>
    %cst_80 = arith.constant 5.000000e-01 : f32
    %268 = vector.broadcast %cst_80 : f32 to vector<8x128xf32>
    %269 = arith.mulf %268, %266 : vector<8x128xf32>
    %270 = arith.mulf %269, %267 : vector<8x128xf32>
    %271 = arith.mulf %270, %267 : vector<8x128xf32>
    %cst_81 = arith.constant 1.500000e+00 : f32
    %272 = vector.broadcast %cst_81 : f32 to vector<8x128xf32>
    %273 = arith.subf %272, %271 : vector<8x128xf32>
    %274 = arith.mulf %267, %273 : vector<8x128xf32>
    %275 = arith.mulf %264, %274 : vector<8x128xf32>
    %276 = math.absf %259 : vector<8x128xf32>
    %cst_82 = arith.constant 0.000000e+00 : f32
    %277 = vector.broadcast %cst_82 : f32 to vector<8x128xf32>
    %278 = arith.cmpf olt, %259, %277 : vector<8x128xf32>
    %cst_83 = arith.constant -1.000000e+00 : f32
    %cst_84 = arith.constant 1.000000e+00 : f32
    %279 = vector.broadcast %cst_83 : f32 to vector<8x128xf32>
    %280 = vector.broadcast %cst_84 : f32 to vector<8x128xf32>
    %281 = arith.select %278, %279, %280 : vector<8x128xi1>, vector<8x128xf32>
    %cst_85 = arith.constant 2.000000e+00 : f32
    %282 = vector.broadcast %cst_85 : f32 to vector<8x128xf32>
    %283 = arith.mulf %282, %281 : vector<8x128xf32>
    %284 = arith.cmpf ogt, %275, %276 : vector<8x128xf32>
    %285 = arith.select %284, %276, %275 : vector<8x128xi1>, vector<8x128xf32>
    %286 = arith.select %284, %275, %276 : vector<8x128xi1>, vector<8x128xf32>
    %cst_86 = arith.constant 0.414213568 : f32
    %287 = vector.broadcast %cst_86 : f32 to vector<8x128xf32>
    %288 = arith.mulf %287, %286 : vector<8x128xf32>
    %289 = arith.cmpf ogt, %285, %288 : vector<8x128xf32>
    %290 = arith.subf %285, %286 : vector<8x128xf32>
    %291 = arith.select %289, %290, %285 : vector<8x128xi1>, vector<8x128xf32>
    %292 = arith.addf %285, %286 : vector<8x128xf32>
    %293 = arith.select %289, %292, %286 : vector<8x128xi1>, vector<8x128xf32>
    %cst_87 = arith.constant 1.000000e-30 : f32
    %294 = vector.broadcast %cst_87 : f32 to vector<8x128xf32>
    %295 = arith.maximumf %293, %294 : vector<8x128xf32>
    %296 = tpu.reciprocal %295 : vector<8x128xf32> -> vector<8x128xf32>
    %297 = arith.mulf %295, %296 : vector<8x128xf32>
    %cst_88 = arith.constant 2.000000e+00 : f32
    %298 = vector.broadcast %cst_88 : f32 to vector<8x128xf32>
    %299 = arith.subf %298, %297 : vector<8x128xf32>
    %300 = arith.mulf %296, %299 : vector<8x128xf32>
    %301 = arith.mulf %291, %300 : vector<8x128xf32>
    %302 = arith.mulf %301, %301 : vector<8x128xf32>
    %cst_89 = arith.constant 0.0805374458 : f32
    %303 = vector.broadcast %cst_89 : f32 to vector<8x128xf32>
    %304 = arith.mulf %303, %302 : vector<8x128xf32>
    %cst_90 = arith.constant 0.138776854 : f32
    %305 = vector.broadcast %cst_90 : f32 to vector<8x128xf32>
    %306 = arith.subf %304, %305 : vector<8x128xf32>
    %307 = arith.mulf %306, %302 : vector<8x128xf32>
    %cst_91 = arith.constant 0.199777111 : f32
    %308 = vector.broadcast %cst_91 : f32 to vector<8x128xf32>
    %309 = arith.addf %307, %308 : vector<8x128xf32>
    %310 = arith.mulf %309, %302 : vector<8x128xf32>
    %cst_92 = arith.constant 0.333329499 : f32
    %311 = vector.broadcast %cst_92 : f32 to vector<8x128xf32>
    %312 = arith.subf %310, %311 : vector<8x128xf32>
    %313 = arith.mulf %312, %302 : vector<8x128xf32>
    %314 = arith.mulf %313, %301 : vector<8x128xf32>
    %315 = arith.addf %314, %301 : vector<8x128xf32>
    %cst_93 = arith.constant 0.785398185 : f32
    %316 = vector.broadcast %cst_93 : f32 to vector<8x128xf32>
    %317 = arith.addf %315, %316 : vector<8x128xf32>
    %318 = arith.select %289, %317, %315 : vector<8x128xi1>, vector<8x128xf32>
    %cst_94 = arith.constant 1.57079637 : f32
    %319 = vector.broadcast %cst_94 : f32 to vector<8x128xf32>
    %320 = arith.subf %319, %318 : vector<8x128xf32>
    %321 = arith.select %284, %320, %318 : vector<8x128xi1>, vector<8x128xf32>
    %322 = arith.mulf %283, %321 : vector<8x128xf32>
    %cst_95 = arith.constant 9.99999997E-7 : f32
    %323 = vector.broadcast %cst_95 : f32 to vector<8x128xf32>
    %324 = arith.cmpf olt, %275, %323 : vector<8x128xf32>
    %cst_96 = arith.constant 1.000000e+00 : f32
    %325 = vector.broadcast %cst_96 : f32 to vector<8x128xf32>
    %326 = arith.select %324, %259, %325 : vector<8x128xi1>, vector<8x128xf32>
    %327 = tpu.reciprocal %326 : vector<8x128xf32> -> vector<8x128xf32>
    %328 = arith.mulf %326, %327 : vector<8x128xf32>
    %cst_97 = arith.constant 2.000000e+00 : f32
    %329 = vector.broadcast %cst_97 : f32 to vector<8x128xf32>
    %330 = arith.subf %329, %328 : vector<8x128xf32>
    %331 = arith.mulf %327, %330 : vector<8x128xf32>
    %cst_98 = arith.constant 2.000000e+00 : f32
    %332 = vector.broadcast %cst_98 : f32 to vector<8x128xf32>
    %333 = arith.mulf %332, %331 : vector<8x128xf32>
    %cst_99 = arith.constant 0.666666686 : f32
    %334 = vector.broadcast %cst_99 : f32 to vector<8x128xf32>
    %335 = arith.mulf %334, %264 : vector<8x128xf32>
    %336 = arith.mulf %335, %331 : vector<8x128xf32>
    %337 = arith.mulf %336, %331 : vector<8x128xf32>
    %338 = arith.mulf %337, %331 : vector<8x128xf32>
    %339 = arith.subf %333, %338 : vector<8x128xf32>
    %340 = arith.mulf %322, %274 : vector<8x128xf32>
    %341 = arith.select %324, %339, %340 : vector<8x128xi1>, vector<8x128xf32>
    %342 = arith.mulf %341, %238 : vector<8x128xf32>
    %343 = arith.mulf %341, %245 : vector<8x128xf32>
    %344 = arith.mulf %341, %252 : vector<8x128xf32>
    %345 = math.absf %322 : vector<8x128xf32>
    %cst_100 = arith.constant 1.000000e-03 : f32
    %346 = vector.broadcast %cst_100 : f32 to vector<8x128xf32>
    %347 = arith.cmpf olt, %345, %346 : vector<8x128xf32>
    %cst_101 = arith.constant 1.000000e+00 : f32
    %348 = vector.broadcast %cst_101 : f32 to vector<8x128xf32>
    %349 = arith.select %347, %348, %322 : vector<8x128xi1>, vector<8x128xf32>
    %350 = tpu.reciprocal %349 : vector<8x128xf32> -> vector<8x128xf32>
    %351 = arith.mulf %349, %350 : vector<8x128xf32>
    %cst_102 = arith.constant 2.000000e+00 : f32
    %352 = vector.broadcast %cst_102 : f32 to vector<8x128xf32>
    %353 = arith.subf %352, %351 : vector<8x128xf32>
    %354 = arith.mulf %350, %353 : vector<8x128xf32>
    %355 = arith.mulf %354, %354 : vector<8x128xf32>
    %cst_103 = arith.constant 5.000000e-01 : f32
    %356 = vector.broadcast %cst_103 : f32 to vector<8x128xf32>
    %357 = arith.mulf %356, %259 : vector<8x128xf32>
    %358 = arith.mulf %357, %274 : vector<8x128xf32>
    %359 = arith.mulf %358, %354 : vector<8x128xf32>
    %360 = arith.subf %355, %359 : vector<8x128xf32>
    %cst_104 = arith.constant 0.0833333358 : f32
    %361 = vector.broadcast %cst_104 : f32 to vector<8x128xf32>
    %362 = arith.select %347, %361, %360 : vector<8x128xi1>, vector<8x128xf32>
    %363 = arith.mulf %343, %231 : vector<8x128xf32>
    %364 = arith.mulf %344, %230 : vector<8x128xf32>
    %365 = arith.subf %363, %364 : vector<8x128xf32>
    %366 = arith.mulf %344, %229 : vector<8x128xf32>
    %367 = arith.mulf %342, %231 : vector<8x128xf32>
    %368 = arith.subf %366, %367 : vector<8x128xf32>
    %369 = arith.mulf %342, %230 : vector<8x128xf32>
    %370 = arith.mulf %343, %229 : vector<8x128xf32>
    %371 = arith.subf %369, %370 : vector<8x128xf32>
    %372 = arith.mulf %343, %371 : vector<8x128xf32>
    %373 = arith.mulf %344, %368 : vector<8x128xf32>
    %374 = arith.subf %372, %373 : vector<8x128xf32>
    %375 = arith.mulf %344, %365 : vector<8x128xf32>
    %376 = arith.mulf %342, %371 : vector<8x128xf32>
    %377 = arith.subf %375, %376 : vector<8x128xf32>
    %378 = arith.mulf %342, %368 : vector<8x128xf32>
    %379 = arith.mulf %343, %365 : vector<8x128xf32>
    %380 = arith.subf %378, %379 : vector<8x128xf32>
    %cst_105 = arith.constant 5.000000e-01 : f32
    %381 = vector.broadcast %cst_105 : f32 to vector<8x128xf32>
    %382 = arith.mulf %381, %365 : vector<8x128xf32>
    %383 = arith.subf %229, %382 : vector<8x128xf32>
    %384 = arith.mulf %362, %374 : vector<8x128xf32>
    %385 = arith.addf %383, %384 : vector<8x128xf32>
    %cst_106 = arith.constant 5.000000e-01 : f32
    %386 = vector.broadcast %cst_106 : f32 to vector<8x128xf32>
    %387 = arith.mulf %386, %368 : vector<8x128xf32>
    %388 = arith.subf %230, %387 : vector<8x128xf32>
    %389 = arith.mulf %362, %377 : vector<8x128xf32>
    %390 = arith.addf %388, %389 : vector<8x128xf32>
    %cst_107 = arith.constant 5.000000e-01 : f32
    %391 = vector.broadcast %cst_107 : f32 to vector<8x128xf32>
    %392 = arith.mulf %391, %371 : vector<8x128xf32>
    %393 = arith.subf %231, %392 : vector<8x128xf32>
    %394 = arith.mulf %362, %380 : vector<8x128xf32>
    %395 = arith.addf %393, %394 : vector<8x128xf32>
    %c0_108 = arith.constant 0 : index
    %c0_109 = arith.constant 0 : index
    %c0_110 = arith.constant 0 : index
    %396 = vector.load %arg4[%c0_108, %c0_109, %c0_110] : memref<6x8x128xf32, #tpu.memory_space<vmem>>, vector<1x8x128xf32>
    %397 = vector.shape_cast %396 : vector<1x8x128xf32> to vector<8x128xf32>
    %398 = vector.shape_cast %385 : vector<8x128xf32> to vector<1x8x128xf32>
    tpu.vector_store %arg4[%c0_108, %c0_109, %c0_110], %398 {strides = array<i32>} : memref<6x8x128xf32, #tpu.memory_space<vmem>>, vector<1x8x128xf32>,
    %c1_111 = arith.constant 1 : index
    %c0_112 = arith.constant 0 : index
    %c0_113 = arith.constant 0 : index
    %399 = vector.load %arg4[%c1_111, %c0_112, %c0_113] : memref<6x8x128xf32, #tpu.memory_space<vmem>>, vector<1x8x128xf32>
    %400 = vector.shape_cast %399 : vector<1x8x128xf32> to vector<8x128xf32>
    %401 = vector.shape_cast %390 : vector<8x128xf32> to vector<1x8x128xf32>
    tpu.vector_store %arg4[%c1_111, %c0_112, %c0_113], %401 {strides = array<i32>} : memref<6x8x128xf32, #tpu.memory_space<vmem>>, vector<1x8x128xf32>,
    %c2_114 = arith.constant 2 : index
    %c0_115 = arith.constant 0 : index
    %c0_116 = arith.constant 0 : index
    %402 = vector.load %arg4[%c2_114, %c0_115, %c0_116] : memref<6x8x128xf32, #tpu.memory_space<vmem>>, vector<1x8x128xf32>
    %403 = vector.shape_cast %402 : vector<1x8x128xf32> to vector<8x128xf32>
    %404 = vector.shape_cast %395 : vector<8x128xf32> to vector<1x8x128xf32>
    tpu.vector_store %arg4[%c2_114, %c0_115, %c0_116], %404 {strides = array<i32>} : memref<6x8x128xf32, #tpu.memory_space<vmem>>, vector<1x8x128xf32>,
    %c3_117 = arith.constant 3 : index
    %c0_118 = arith.constant 0 : index
    %c0_119 = arith.constant 0 : index
    %405 = vector.load %arg4[%c3_117, %c0_118, %c0_119] : memref<6x8x128xf32, #tpu.memory_space<vmem>>, vector<1x8x128xf32>
    %406 = vector.shape_cast %405 : vector<1x8x128xf32> to vector<8x128xf32>
    %407 = vector.shape_cast %342 : vector<8x128xf32> to vector<1x8x128xf32>
    tpu.vector_store %arg4[%c3_117, %c0_118, %c0_119], %407 {strides = array<i32>} : memref<6x8x128xf32, #tpu.memory_space<vmem>>, vector<1x8x128xf32>,
    %c4_120 = arith.constant 4 : index
    %c0_121 = arith.constant 0 : index
    %c0_122 = arith.constant 0 : index
    %408 = vector.load %arg4[%c4_120, %c0_121, %c0_122] : memref<6x8x128xf32, #tpu.memory_space<vmem>>, vector<1x8x128xf32>
    %409 = vector.shape_cast %408 : vector<1x8x128xf32> to vector<8x128xf32>
    %410 = vector.shape_cast %343 : vector<8x128xf32> to vector<1x8x128xf32>
    tpu.vector_store %arg4[%c4_120, %c0_121, %c0_122], %410 {strides = array<i32>} : memref<6x8x128xf32, #tpu.memory_space<vmem>>, vector<1x8x128xf32>,
    %c5_123 = arith.constant 5 : index
    %c0_124 = arith.constant 0 : index
    %c0_125 = arith.constant 0 : index
    %411 = vector.load %arg4[%c5_123, %c0_124, %c0_125] : memref<6x8x128xf32, #tpu.memory_space<vmem>>, vector<1x8x128xf32>
    %412 = vector.shape_cast %411 : vector<1x8x128xf32> to vector<8x128xf32>
    %413 = vector.shape_cast %344 : vector<8x128xf32> to vector<1x8x128xf32>
    tpu.vector_store %arg4[%c5_123, %c0_124, %c0_125], %413 {strides = array<i32>} : memref<6x8x128xf32, #tpu.memory_space<vmem>>, vector<1x8x128xf32>,
    return
  }
  func.func @transform_0(%arg0: i32) -> (i32, i32, i32) {
    %c0_i32 = arith.constant 0 : i32
    %c0_i32_0 = arith.constant 0 : i32
    %c0_i32_1 = arith.constant 0 : i32
    return %c0_i32, %arg0, %c0_i32_0 : i32, i32, i32
  }
  func.func @transform_1(%arg0: i32) -> (i32, i32, i32) {
    %c0_i32 = arith.constant 0 : i32
    %c0_i32_0 = arith.constant 0 : i32
    %c0_i32_1 = arith.constant 0 : i32
    return %c0_i32, %arg0, %c0_i32_0 : i32, i32, i32
  }
  func.func @transform_2(%arg0: i32) -> (i32, i32, i32) {
    %c0_i32 = arith.constant 0 : i32
    %c0_i32_0 = arith.constant 0 : i32
    %c0_i32_1 = arith.constant 0 : i32
    return %c0_i32, %arg0, %c0_i32_0 : i32, i32, i32
  }
  func.func @transform_3(%arg0: i32) -> (i32, i32, i32) {
    %c0_i32 = arith.constant 0 : i32
    %c0_i32_0 = arith.constant 0 : i32
    %c0_i32_1 = arith.constant 0 : i32
    return %c0_i32, %arg0, %c0_i32_0 : i32, i32, i32
  }
}

</mosaic_0001>

<bundles_post_ra>
// kernel: pose_graph_forward.1
= control target key start
LH: loop header
LB: loop body
LE: loop exit
PB: predicated region body
PF: predicated region fallthrough
CT: control target
= control target key end

     0   :  { %s768_s0 = inlined_call_operand.vmem [shape: f32[7,8,128], index: 0, kind: input, shape index: {}]   ;;  %s769_s1 = inlined_call_operand.vmem [shape: f32[7,8,128], index: 1, kind: input, shape index: {}]   ;;  %s770_s2 = inlined_call_operand.vmem [shape: f32[7,8,128], index: 2, kind: input, shape index: {}]   ;;  %s771_s3 = inlined_call_operand.vmem [shape: f32[6,8,128], index: 3, kind: output, shape index: {}]  }
   0x1   :  { %v427_v0 = vld [vmem:[%s768_s0] sm:$0xff]  ;;  %v432_v1 = vld [vmem:[%s768_s0 + $0x8] sm:$0xff]  ;;  %v437_v2 = vld [vmem:[%s768_s0 + $0x10] sm:$0xff] }
   0x2   :  { %v371_v3 = vld [vmem:[%s768_s0 + $0x18] sm:$0xff]  ;;  %v372_v4 = vld [vmem:[%s768_s0 + $0x20] sm:$0xff]  ;;  %v373_v5 = vld [vmem:[%s768_s0 + $0x28] sm:$0xff] }
   0x3   :  { %v448_v6 = vsub.f32 0.0, %v371_v3  ;;  %v450_v7 = vsub.f32 0.0, %v372_v4  ;;  %v452_v8 = vsub.f32 0.0, %v373_v5  ;;  %v457_v9 = vld [vmem:[%s769_s1 + $0x8] sm:$0xff]  ;;  %v377_v10 = vld [vmem:[%s769_s1 + $0x18] sm:$0xff]  ;;  %v378_v11 = vld [vmem:[%s769_s1 + $0x20] sm:$0xff] }
   0x4   :  { %v468_v12 = vld [vmem:[%s769_s1 + $0x10] sm:$0xff]  ;;  %v379_v13 = vld [vmem:[%s769_s1 + $0x28] sm:$0xff]  ;;  %v490_v21 = vsub.f32 0.0, %v377_v10  ;;  %v492_v22 = vsub.f32 0.0, %v378_v11  ;;  %v501_v27 = vld [vmem:[%s769_s1] sm:$0xff] }
   0x5   :  { %v476_v14 = vld [vmem:[%s769_s1 + $0x30] sm:$0xff]  ;;  %v56_v15 = vmul.f32 %v437_v2, %v450_v7  ;;  %v57_v16 = vmul.f32 %v432_v1, %v452_v8  ;;  %v59_v17 = vmul.f32 %v452_v8, %v427_v0  ;;  %v60_v18 = vmul.f32 %v437_v2, %v448_v6 }
   0x6   :  { %v62_v19 = vmul.f32 %v432_v1, %v448_v6  ;;  %v63_v20 = vmul.f32 %v450_v7, %v427_v0  ;;  %v494_v25 = vsub.f32 0.0, %v379_v13  ;;  %v159_v26 = vmul.f32 %v476_v14, %v448_v6  ;;  %v512_v32 = vld [vmem:[%s768_s0 + $0x30] sm:$0xff] }
   0x7   :  { %v58_v23 = vsub.f32 %v56_v15, %v57_v16  ;;  %v61_v24 = vsub.f32 %v59_v17, %v60_v18  ;;  %v92_v29 = vmul.f32 %v468_v12, %v492_v22  ;;  %v96_v30 = vmul.f32 %v468_v12, %v490_v21 }
   0x8   :  { %v64_v28 = vsub.f32 %v62_v19, %v63_v20  ;;  %v98_v31 = vmul.f32 %v457_v9, %v490_v21  ;;  %v93_v43 = vmul.f32 %v457_v9, %v494_v25  ;;  %v95_v44 = vmul.f32 %v494_v25, %v501_v27 }
   0x9   :  { %v66_v33 = vmul.f32 %v61_v24, %v452_v8  ;;  %v68_v34 = vmul.f32 %v58_v23, %v452_v8  ;;  %v71_v35 = vmul.f32 %v61_v24, %v448_v6  ;;  %v72_v36 = vmul.f32 %v58_v23, %v450_v7 }
   0xa   :  { %v65_v37 = vmul.f32 %v64_v28, %v450_v7  ;;  %v69_v38 = vmul.f32 %v64_v28, %v448_v6  ;;  %v74_v39 = vmul.f32 %v512_v32, %v58_v23  ;;  %v78_v40 = vmul.f32 %v512_v32, %v61_v24 }
   0xb   :  { %v73_v41 = vsub.f32 %v71_v35, %v72_v36  ;;  %v82_v42 = vmul.f32 %v512_v32, %v64_v28  ;;  %v99_v47 = vmul.f32 %v492_v22, %v501_v27  ;;  %v158_v48 = vmul.f32 %v512_v32, %v490_v21 }
   0xc   :  { %v67_v45 = vsub.f32 %v65_v37, %v66_v33  ;;  %v70_v46 = vsub.f32 %v68_v34, %v69_v38  ;;  %v94_v50 = vsub.f32 %v92_v29, %v93_v43  ;;  %v97_v51 = vsub.f32 %v95_v44, %v96_v30 }
   0xd   :  { %v83_v49 = vadd.f32 %v82_v42, %v73_v41  ;;  %v161_v52 = vmul.f32 %v494_v25, %v450_v7  ;;  %v100_v55 = vsub.f32 %v98_v31, %v99_v47  ;;  %v160_v56 = vadd.f32 %v159_v26, %v158_v48 }
   0xe   :  { %v75_v53 = vadd.f32 %v74_v39, %v67_v45  ;;  %v79_v54 = vadd.f32 %v78_v40, %v70_v46  ;;  %v102_v58 = vmul.f32 %v97_v51, %v494_v25  ;;  %v104_v59 = vmul.f32 %v94_v50, %v494_v25 }
   0xf   :  { %v84_v57 = vmul.f32 2.0, %v83_v49  ;;  %v107_v60 = vmul.f32 %v97_v51, %v490_v21  ;;  %v101_v63 = vmul.f32 %v100_v55, %v492_v22  ;;  %v105_v3 = vmul.f32 %v100_v55, %v490_v21 }
  0x10   :  { %v76_v61 = vmul.f32 2.0, %v75_v53  ;;  %v80_v62 = vmul.f32 2.0, %v79_v54  ;;  %v108_v5 = vmul.f32 %v94_v50, %v492_v22  ;;  %v110_v10 = vmul.f32 %v476_v14, %v94_v50  ;;  %v588_v50 = vld [vmem:[%s770_s2 + $0x8] sm:$0xff] }
  0x11   :  { %v539_v4 = vadd.f32 %v437_v2, %v84_v57  ;;  %v114_v11 = vmul.f32 %v476_v14, %v97_v51  ;;  %v103_v16 = vsub.f32 %v101_v63, %v102_v58  ;;  %v106_v17 = vsub.f32 %v104_v59, %v105_v3  ;;  %v612_v57 = vld [vmem:[%s770_s2] sm:$0xff] }
  0x12   :  { %v545_v13 = vadd.f32 %v76_v61, %v427_v0  ;;  %v548_v15 = vadd.f32 %v432_v1, %v80_v62  ;;  %v109_v19 = vsub.f32 %v107_v60, %v108_v5  ;;  %v118_v2 = vmul.f32 %v476_v14, %v100_v55 }
  0x13   :  { %v88_v18 = vsub.f32 0.0, %v539_v4  ;;  %v162_v20 = vadd.f32 %v161_v52, %v160_v56  ;;  %v111_v26 = vadd.f32 %v110_v10, %v103_v16  ;;  %v115_v28 = vadd.f32 %v114_v11, %v106_v17 }
  0x14   :  { %v86_v23 = vsub.f32 0.0, %v545_v13  ;;  %v87_v24 = vsub.f32 0.0, %v548_v15  ;;  %v119_v29 = vadd.f32 %v118_v2, %v109_v19  ;;  %v163_v0 = vmul.f32 %v492_v22, %v452_v8 }
  0x15   :  { %v165_v1 = vmul.f32 %v512_v32, %v492_v22  ;;  %v166_v30 = vmul.f32 %v494_v25, %v448_v6  ;;  %v112_v31 = vmul.f32 2.0, %v111_v26  ;;  %v116_v33 = vmul.f32 2.0, %v115_v28  ;;  %v637_v26 = vld [vmem:[%s770_s2 + $0x30] sm:$0xff] }
  0x16   :  { %v168_v34 = vmul.f32 %v476_v14, %v450_v7  ;;  %v170_v35 = vmul.f32 %v490_v21, %v452_v8  ;;  %v120_v36 = vmul.f32 2.0, %v119_v29  ;;  %v564_v37 = vsub.f32 %v162_v20, %v163_v0  ;;  %v632_v20 = vld [vmem:[%s770_s2 + $0x18] sm:$0xff] }
  0x17   :  { %v167_v38 = vsub.f32 %v165_v1, %v166_v30  ;;  %v172_v39 = vmul.f32 %v512_v32, %v494_v25  ;;  %v113_v40 = vadd.f32 %v112_v31, %v501_v27  ;;  %v117_v41 = vadd.f32 %v457_v9, %v116_v33 }
  0x18   :  { %v173_v42 = vmul.f32 %v492_v22, %v448_v6  ;;  %v175_v43 = vmul.f32 %v490_v21, %v450_v7  ;;  %v121_v44 = vadd.f32 %v468_v12, %v120_v36  ;;  %v177_v46 = vmul.f32 %v476_v14, %v452_v8  ;;  %v593_v12 = vld [vmem:[%s770_s2 + $0x10] sm:$0xff] }
  0x19   :  { %v169_v45 = vadd.f32 %v168_v34, %v167_v38  ;;  %v179_v47 = vmul.f32 %v476_v14, %v512_v32  ;;  %v579_v48 = vsub.f32 0.0, %v113_v40  ;;  %v581_v27 = vsub.f32 0.0, %v117_v41 }
  0x1a   :  { %v174_v9 = vadd.f32 %v173_v42, %v172_v39  ;;  %v180_v49 = vmul.f32 %v490_v21, %v448_v6  ;;  %v124_v51 = vsub.f32 0.0, %v121_v44  ;;  %v182_v52 = vmul.f32 %v492_v22, %v450_v7 }
  0x1b   :  { %v595_v14 = vadd.f32 %v170_v35, %v169_v45  ;;  %v184_v53 = vmul.f32 %v494_v25, %v452_v8  ;;  %v126_v21 = vmul.f32 %v581_v27, %v452_v8  ;;  %v128_v54 = vmul.f32 %v579_v48, %v452_v8 }
  0x1c   :  { %v131_v55 = vmul.f32 %v581_v27, %v448_v6  ;;  %v132_v56 = vmul.f32 %v579_v48, %v450_v7  ;;  %v125_v22 = vmul.f32 %v124_v51, %v450_v7  ;;  %v129_v25 = vmul.f32 %v124_v51, %v448_v6 }
  0x1d   :  { %v176_v58 = vsub.f32 %v174_v9, %v175_v43  ;;  %v181_v59 = vsub.f32 %v179_v47, %v180_v49  ;;  %v186_v61 = vmul.f32 %v593_v12, %v595_v14  ;;  %v190_v62 = vmul.f32 %v593_v12, %v564_v37 }
  0x1e   :  { %v133_v60 = vsub.f32 %v131_v55, %v132_v56  ;;  %v192_v63 = vmul.f32 %v588_v50, %v564_v37  ;;  %v127_v3 = vsub.f32 %v125_v22, %v126_v21  ;;  %v130_v5 = vsub.f32 %v128_v54, %v129_v25 }
  0x1f   :  { %v622_v10 = vadd.f32 %v177_v46, %v176_v58  ;;  %v183_v11 = vsub.f32 %v181_v59, %v182_v52  ;;  %v193_v2 = vmul.f32 %v595_v14, %v612_v57  ;;  %v229_v13 = vmul.f32 %v637_v26, %v595_v14 }
  0x20   :  { %v134_v16 = vmul.f32 %v133_v60, %v450_v7  ;;  %v138_v17 = vmul.f32 %v133_v60, %v448_v6  ;;  %v151_v19 = vmul.f32 %v512_v32, %v133_v60  ;;  %v135_v28 = vmul.f32 %v130_v5, %v452_v8  ;;  %v384_v60 = vld [vmem:[%s770_s2 + $0x20] sm:$0xff] }
  0x21   :  { %v137_v29 = vmul.f32 %v127_v3, %v452_v8  ;;  %v140_v0 = vmul.f32 %v130_v5, %v448_v6  ;;  %v141_v1 = vmul.f32 %v127_v3, %v450_v7  ;;  %v143_v30 = vmul.f32 %v512_v32, %v127_v3 }
  0x22   :  { %v147_v31 = vmul.f32 %v512_v32, %v130_v5  ;;  %v645_v33 = vsub.f32 %v183_v11, %v184_v53  ;;  %v187_v34 = vmul.f32 %v588_v50, %v622_v10  ;;  %v136_v35 = vsub.f32 %v134_v16, %v135_v28 }
  0x23   :  { %v139_v36 = vsub.f32 %v137_v29, %v138_v17  ;;  %v142_v38 = vsub.f32 %v140_v0, %v141_v1  ;;  %v189_v39 = vmul.f32 %v622_v10, %v612_v57  ;;  %v194_v40 = vsub.f32 %v192_v63, %v193_v2 }
  0x24   :  { %v188_v8 = vsub.f32 %v186_v61, %v187_v34  ;;  %v219_v6 = vmul.f32 %v632_v20, %v645_v33  ;;  %v220_v7 = vmul.f32 %v637_v26, %v564_v37  ;;  %v144_v32 = vadd.f32 %v143_v30, %v136_v35  ;;  %v385_v61 = vld [vmem:[%s770_s2 + $0x28] sm:$0xff] }
  0x25   :  { %v148_v41 = vadd.f32 %v147_v31, %v139_v36  ;;  %v152_v42 = vadd.f32 %v151_v19, %v142_v38  ;;  %v191_v43 = vsub.f32 %v189_v39, %v190_v62  ;;  %v195_v44 = vmul.f32 %v194_v40, %v595_v14 }
  0x26   :  { %v198_v45 = vmul.f32 %v188_v8, %v622_v10  ;;  %v199_v46 = vmul.f32 %v194_v40, %v564_v37  ;;  %v202_v47 = vmul.f32 %v188_v8, %v595_v14  ;;  %v145_v9 = vmul.f32 2.0, %v144_v32 }
  0x27   :  { %v149_v49 = vmul.f32 2.0, %v148_v41  ;;  %v153_v52 = vmul.f32 2.0, %v152_v42  ;;  %v196_v53 = vmul.f32 %v191_v43, %v622_v10  ;;  %v201_v54 = vmul.f32 %v191_v43, %v564_v37 }
  0x28   :  { %v200_v21 = vsub.f32 %v198_v45, %v199_v46  ;;  %v204_v55 = vmul.f32 %v188_v8, %v645_v33  ;;  %v208_v56 = vmul.f32 %v191_v43, %v645_v33  ;;  %v146_v22 = vadd.f32 %v145_v9, %v579_v48 }
  0x29   :  { %v150_v25 = vadd.f32 %v149_v49, %v581_v27  ;;  %v154_v58 = vadd.f32 %v153_v52, %v124_v51  ;;  %v197_v59 = vsub.f32 %v195_v44, %v196_v53  ;;  %v203_v62 = vsub.f32 %v201_v54, %v202_v47 }
  0x2a   :  { %v209_v63 = vadd.f32 %v208_v56, %v200_v21  ;;  %v212_v3 = vmul.f32 %v194_v40, %v645_v33  ;;  %v221_v5 = vadd.f32 %v220_v7, %v219_v6  ;;  %v155_v48 = vadd.f32 %v146_v22, %v86_v23 }
  0x2b   :  { %v156_v27 = vadd.f32 %v150_v25, %v87_v24  ;;  %v157_v51 = vadd.f32 %v154_v58, %v88_v18  ;;  %v205_v11 = vadd.f32 %v204_v55, %v197_v59  ;;  %v222_v19 = vmul.f32 %v385_v61, %v595_v14 }
  0x2c   :  { %v210_v16 = vmul.f32 2.0, %v209_v63  ;;  %v213_v17 = vadd.f32 %v212_v3, %v203_v62  ;;  %v224_v2 = vmul.f32 %v384_v60, %v622_v10  ;;  %v226_v29 = vmul.f32 %v384_v60, %v645_v33 }
  0x2d   :  { %v206_v28 = vmul.f32 2.0, %v205_v11  ;;  %v227_v0 = vmul.f32 %v385_v61, %v564_v37  ;;  %v223_v4 = vadd.f32 %v222_v19, %v221_v5  ;;  %v231_v18 = vmul.f32 %v632_v20, %v622_v10 }
  0x2e   :  { %v211_v15 = vadd.f32 %v588_v50, %v210_v16  ;;  %v214_v23 = vmul.f32 2.0, %v213_v17  ;;  %v233_v30 = vmul.f32 %v385_v61, %v645_v33  ;;  %v234_v31 = vmul.f32 %v384_v60, %v564_v37 }
  0x2f   :  { %v207_v24 = vadd.f32 %v206_v28, %v612_v57  ;;  %v228_v1 = vsub.f32 %v226_v29, %v227_v0  ;;  %v693_v36 = vsub.f32 %v223_v4, %v224_v2  ;;  %v236_v50 = vmul.f32 %v632_v20, %v595_v14 }
  0x30   :  { %v215_v34 = vadd.f32 %v593_v12, %v214_v23  ;;  %v691_v35 = vadd.f32 %v211_v15, %v156_v27  ;;  %v235_v8 = vadd.f32 %v234_v31, %v233_v30  ;;  %v238_v57 = vmul.f32 %v637_v26, %v622_v10 }
  0x31   :  { %v697_v38 = vadd.f32 %v207_v24, %v155_v48  ;;  %v230_v39 = vadd.f32 %v229_v13, %v228_v1  ;;  %v247_v12 = vmul.f32 %v693_v36, %v693_v36  ;;  %v240_v46 = vmul.f32 %v637_v26, %v645_v33 }
  0x32   :  { %v701_v40 = vadd.f32 %v215_v34, %v157_v51  ;;  %v237_v7 = vsub.f32 %v235_v8, %v236_v50  ;;  %v241_v47 = vmul.f32 %v632_v20, %v564_v37  ;;  %v243_v49 = vmul.f32 %v384_v60, %v595_v14 }
  0x33   :  { %v703_v6 = vadd.f32 %v231_v18, %v230_v39  ;;  %v245_v21 = vmul.f32 %v385_v61, %v622_v10  ;;  %v403_v39 = vmov 1.0  }
  0x34   :  { %v707_v32 = vadd.f32 %v238_v57, %v237_v7  ;;  %v242_v9 = vsub.f32 %v240_v46, %v241_v47 }
  0x35   :  { %v248_v41 = vmul.f32 %v703_v6, %v703_v6 }
  0x36   :  { %v250_v43 = vmul.f32 %v707_v32, %v707_v32  ;;  %v244_v53 = vsub.f32 %v242_v9, %v243_v49 }
  0x37   :  { %v249_v42 = vadd.f32 %v248_v41, %v247_v12 }
  0x38   :  { %v246_v56 = vsub.f32 %v244_v53, %v245_v21 }
  0x39   :  { %v251_v44 = vadd.f32 %v250_v43, %v249_v42 }
  0x3a   :  { %v319_v58 = vmul.f32 0.5, %v246_v56  ;;  %v260_v62 = vand.u32 2147483647, %v246_v56  ;;  %vm261_vm3 = vcmp.lt.f32.partialorder %v246_v56, 0.0 }
  0x3b   :  { %v252_v45 = vmax.f32 %v251_v44, 1e-30  ;;  %v301_v18 = vmul.f32 0.6666667, %v251_v44  ;;  %v262_v8 = vsel %vm261_vm3, -1.0, %v403_v39 }
  0x3c   :  { %v263_v7 = vmul.f32 2.0, %v262_v8 }
  0x3d   :  { %395 = vrsqrt.f32 %v252_v45  ;;  %v254_v52 = vmul.f32 0.5, %v252_v45 }
  0x4a   :  { %v396_v54 = vpop.eup %395 }
  0x4b   :  { %v255_v55 = vmul.f32 %v396_v54, %v254_v52 }
  0x4d   :  { %v256_v22 = vmul.f32 %v396_v54, %v255_v55 }
  0x4f   :  { %v257_v25 = vsub.f32 1.5, %v256_v22 }
  0x51   :  { %v258_v59 = vmul.f32 %v396_v54, %v257_v25 }
  0x53   :  { %v259_v63 = vmul.f32 %v258_v59, %v251_v44  ;;  %v719_v26 = vmul.f32 %v319_v58, %v258_v59 }
  0x55   :  { %vm264_vm0 = vcmp.gt.f32.partialorder %v259_v63, %v260_v62  ;;  %vm294_vm2 = vcmp.lt.f32.partialorder %v259_v63, 1e-06 }
  0x56   :  { %v265_v37 = vsel %vm264_vm0, %v260_v62, %v259_v63  ;;  %v266_v14 = vsel %vm264_vm0, %v259_v63, %v260_v62  ;;  %v295_v61 = vsel %vm294_vm2, %v246_v56, 1.0 }
  0x57   :  { %v267_v20 = vmul.f32 0.41421357, %v266_v14  ;;  %v271_v33 = vadd.f32 %v266_v14, %v265_v37  ;;  %v269_v5 = vsub.f32 %v265_v37, %v266_v14 }
  0x59   :  { %vm268_vm1 = vcmp.gt.f32.partialorder %v265_v37, %v267_v20 }
  0x5a   :  { %v272_v10 = vsel %vm268_vm1, %v271_v33, %v266_v14  ;;  %v270_v51 = vsel %vm268_vm1, %v269_v5, %v265_v37 }
  0x5b   :  { %v273_v60 = vmax.f32 %v272_v10, 1e-30 }
  0x5d   :  { %397 = vrcp.f32 %v273_v60 }
  0x5e   :  { %399 = vrcp.f32 %v295_v61 }
  0x6a   :  { %v398_v3 = vpop.eup %397 }
  0x6b   :  { %v275_v48 = vmul.f32 %v398_v3, %v273_v60  ;;  %v400_v17 = vpop.eup %399 }
  0x6c   :  { %v297_v28 = vmul.f32 %v400_v17, %v295_v61 }
  0x6d   :  { %v276_v27 = vsub.f32 2.0, %v275_v48 }
  0x6e   :  { %v298_v13 = vsub.f32 2.0, %v297_v28 }
  0x6f   :  { %v277_v11 = vmul.f32 %v398_v3, %v276_v27 }
  0x70   :  { %v299_v4 = vmul.f32 %v400_v17, %v298_v13 }
  0x71   :  { %v278_v16 = vmul.f32 %v277_v11, %v270_v51 }
  0x72   :  { %v302_v30 = vmul.f32 %v301_v18, %v299_v4  ;;  %v300_v41 = vmul.f32 2.0, %v299_v4 }
  0x73   :  { %v279_v19 = vmul.f32 %v278_v16, %v278_v16 }
  0x74   :  { %v303_v50 = vmul.f32 %v302_v30, %v299_v4 }
  0x75   :  { %v280_v2 = vmul.f32 0.080537446, %v279_v19 }
  0x76   :  { %v304_v42 = vmul.f32 %v303_v50, %v299_v4 }
  0x77   :  { %v387_v29 = vadd.f32 -0.13877685, %v280_v2 }
  0x78   :  { %v305_v44 = vsub.f32 %v300_v41, %v304_v42 }
  0x79   :  { %v282_v0 = vmul.f32 %v387_v29, %v279_v19 }
  0x7b   :  { %v283_v15 = vadd.f32 0.19977711, %v282_v0 }
  0x7d   :  { %v284_v23 = vmul.f32 %v283_v15, %v279_v19 }
  0x7f   :  { %v388_v24 = vadd.f32 -0.3333295, %v284_v23 }
  0x81   :  { %v286_v1 = vmul.f32 %v388_v24, %v279_v19 }
  0x83   :  { %v287_v31 = vmul.f32 %v286_v1, %v278_v16 }
  0x85   :  { %v288_v34 = vadd.f32 %v287_v31, %v278_v16 }
  0x87   :  { %v289_v57 = vadd.f32 0.7853982, %v288_v34 }
  0x89   :  { %v290_v12 = vsel %vm268_vm1, %v289_v57, %v288_v34 }
  0x8a   :  { %v291_v43 = vsub.f32 1.5707964, %v290_v12 }
  0x8c   :  { %v292_v45 = vsel %vm264_vm0, %v291_v43, %v290_v12 }
  0x8d   :  { %v293_v46 = vmul.f32 %v292_v45, %v263_v7 }
  0x8f   :  { %v306_v47 = vmul.f32 %v293_v46, %v258_v59  ;;  %v311_v9 = vand.u32 2147483647, %v293_v46 }
  0x91   :  { %v307_v49 = vsel %vm294_vm2, %v305_v44, %v306_v47  ;;  %vm729_vm4 = vcmp.lt.f32.partialorder %v311_v9, 0.001 }
  0x92   :  { %v308_v53 = vmul.f32 %v307_v49, %v693_v36  ;;  %v309_v21 = vmul.f32 %v307_v49, %v703_v6  ;;  %v310_v54 = vmul.f32 %v307_v49, %v707_v32  ;;  %v313_v55 = vsel %vm729_vm4, 1.0, %v293_v46 }
  0x93   :  { %401 = vrcp.f32 %v313_v55 }
  0x94   :  { %v324_v56 = vmul.f32 %v309_v21, %v701_v40  ;;  %v325_v22 = vmul.f32 %v310_v54, %v691_v35  ;;  %v327_v25 = vmul.f32 %v310_v54, %v697_v38  ;;  %v328_v58 = vmul.f32 %v308_v53, %v701_v40  ;;  %391 = vst [vmem:[%s771_s3 + $0x18] sm:$0xff] %v308_v53 }
  0x95   :  { %392 = vst [vmem:[%s771_s3 + $0x20] sm:$0xff] %v309_v21  ;;  %393 = vst [vmem:[%s771_s3 + $0x28] sm:$0xff] %v310_v54  ;;  %v330_v36 = vmul.f32 %v308_v53, %v691_v35  ;;  %v331_v6 = vmul.f32 %v309_v21, %v697_v38 }
  0x96   :  { %v326_v32 = vsub.f32 %v324_v56, %v325_v22  ;;  %v329_v59 = vsub.f32 %v327_v25, %v328_v58 }
  0x97   :  { %v332_v62 = vsub.f32 %v330_v36, %v331_v6 }
  0x98   :  { %v334_v63 = vmul.f32 %v329_v59, %v310_v54  ;;  %v342_v37 = vmul.f32 0.5, %v326_v32  ;;  %v336_v14 = vmul.f32 %v326_v32, %v310_v54  ;;  %v346_v20 = vmul.f32 0.5, %v329_v59 }
  0x99   :  { %v333_v33 = vmul.f32 %v332_v62, %v309_v21  ;;  %v337_v10 = vmul.f32 %v332_v62, %v308_v53  ;;  %v339_v60 = vmul.f32 %v329_v59, %v308_v53  ;;  %v340_v61 = vmul.f32 %v326_v32, %v309_v21 }
  0x9a   :  { %v343_v3 = vsub.f32 %v697_v38, %v342_v37  ;;  %v347_v5 = vsub.f32 %v691_v35, %v346_v20  ;;  %v350_v48 = vmul.f32 0.5, %v332_v62 }
  0x9b   :  { %v335_v27 = vsub.f32 %v333_v33, %v334_v63  ;;  %v338_v51 = vsub.f32 %v336_v14, %v337_v10  ;;  %v341_v11 = vsub.f32 %v339_v60, %v340_v61 }
  0x9c   :  { %v351_v16 = vsub.f32 %v701_v40, %v350_v48 }
  0xa0   :  { %v402_v17 = vpop.eup %401 }
  0xa1   :  { %v315_v19 = vmul.f32 %v402_v17, %v313_v55 }
  0xa3   :  { %v316_v2 = vsub.f32 2.0, %v315_v19 }
  0xa5   :  { %v317_v28 = vmul.f32 %v402_v17, %v316_v2 }
  0xa7   :  { %v318_v29 = vmul.f32 %v317_v28, %v317_v28  ;;  %v321_v0 = vmul.f32 %v719_v26, %v317_v28 }
  0xa9   :  { %v322_v13 = vsub.f32 %v318_v29, %v321_v0 }
  0xab   :  { %v323_v15 = vsel %vm729_vm4, 0.083333336, %v322_v13 }
  0xac   :  { %v344_v38 = vmul.f32 %v335_v27, %v323_v15  ;;  %v348_v23 = vmul.f32 %v338_v51, %v323_v15  ;;  %v352_v35 = vmul.f32 %v341_v11, %v323_v15 }
  0xae   :  { %v345_v4 = vadd.f32 %v344_v38, %v343_v3  ;;  %v349_v18 = vadd.f32 %v348_v23, %v347_v5  ;;  %v353_v24 = vadd.f32 %v352_v35, %v351_v16 }
  0xb0   :  { %354 = vst [vmem:[%s771_s3] sm:$0xff] %v345_v4  ;;  %389 = vst [vmem:[%s771_s3 + $0x8] sm:$0xff] %v349_v18 }
  0xb1   :  { %390 = vst [vmem:[%s771_s3 + $0x10] sm:$0xff] %v353_v24 }

</bundles_post_ra>
